<compile_context>
chip_gen: v7x
topology: tpu7x:2x2x1
jax: 0.10.0
libtpu: 0.0.40
codegen_flags: <defaults>
</compile_context>

<pallas_src>
import math

import jax
import jax.numpy as jnp
from jax.experimental import pallas as pl
from jax.experimental.pallas import tpu as pltpu

_EPS = 1e-5
_VMEM_LIMIT = 32 * 1024 * 1024   # fits scoped budgets on v5e / v6e / v7x


def _lcm(a, b):
    return a * b // math.gcd(a, b)


def _cparams():
    return pltpu.CompilerParams(
        dimension_semantics=("parallel",),   # independent tiles -> 2 TCs on v7x
        vmem_limit_bytes=_VMEM_LIMIT)


# -----------------------------------------------------------------------------
# pltpu.roll direction probe (tiny one-off kernel, cached).  Falls back to a
# concat-based circular shift if roll is unavailable or behaves unexpectedly.
# -----------------------------------------------------------------------------
_ROLL_DIR = None


def _roll_direction():
    global _ROLL_DIR
    if _ROLL_DIR is not None:
        return _ROLL_DIR
    try:
        n = 256

        def probe(x_ref, o_ref):
            o_ref[0] = pltpu.roll(x_ref[...], shift=1, axis=1)
            o_ref[1] = pltpu.roll(x_ref[...], shift=n - 1, axis=1)

        xp = jnp.broadcast_to(jnp.arange(n, dtype=jnp.float32)[None, :], (8, n))
        out = pl.pallas_call(
            probe, out_shape=jax.ShapeDtypeStruct((2, 8, n), jnp.float32))(xp)
        fwd, bwd = float(out[0, 0, 5]), float(out[1, 0, 5])
        if fwd == 4.0 and bwd == 6.0:
            _ROLL_DIR = 1          # jnp.roll convention
        elif fwd == 6.0 and bwd == 4.0:
            _ROLL_DIR = -1         # reversed convention
        else:
            _ROLL_DIR = 0
    except Exception:
        _ROLL_DIR = 0              # fall back to concat-based shift
    return _ROLL_DIR


# -----------------------------------------------------------------------------
# In-kernel helpers (traced inside the Pallas kernels).
# -----------------------------------------------------------------------------
def _make_shift_masks(col_mod, L, K):
    """Per-tap validity masks for per-L-segment shifts (built once per tile)."""
    pad = (K - 1) // 2
    masks = []
    for k in range(K):
        s = pad - k
        if s == 0:
            masks.append(None)
        elif s > 0:
            masks.append(col_mod >= s)
        else:
            masks.append(col_mod < (L + s))
    return masks


def _shifted_stack(a, masks, K, roll_dir):
    """(C, n) -> (K*C, n): per-segment shifted copies stacked along sublanes.

    Enables a single fused MXU dot per conv (weights packed as (C_out, K*C)).
    """
    pad = (K - 1) // 2
    n = a.shape[-1]
    zero = jnp.zeros((), a.dtype)
    pieces = []
    for k in range(K):
        s = pad - k
        if s == 0:
            pieces.append(a)
            continue
        if roll_dir != 0:
            rolled = pltpu.roll(a, shift=(roll_dir * s) % n, axis=1)   # XLU slot
        else:   # fallback: circular shift via lane-axis concat
            ss = s % n
            rolled = jnp.concatenate([a[:, n - ss:], a[:, :n - ss]], axis=1)
        pieces.append(jnp.where(masks[k], rolled, zero))
    if K == 1:
        return pieces[0]
    return jnp.concatenate(pieces, axis=0)


# -----------------------------------------------------------------------------
# Kernels
# -----------------------------------------------------------------------------
def _make_stats1_kernel(L, K, tile_n, roll_dir):
    def kernel(x_ref, w1_ref, sums_ref):
        col_mod = jax.lax.broadcasted_iota(jnp.int32, (1, tile_n), 1) % L
        masks = _make_shift_masks(col_mod, L, K)
        xs = _shifted_stack(x_ref[...], masks, K, roll_dir)
        # conv1 (bias dropped: training-mode BN mean subtraction cancels it)
        y1 = jnp.dot(w1_ref[...], xs, preferred_element_type=jnp.float32)
        sums_ref[0] = jnp.concatenate(
            [jnp.sum(y1, axis=1, keepdims=True),
             jnp.sum(y1 * y1, axis=1, keepdims=True)], axis=1)
    return kernel


def _make_main_kernel(L, K, tile_n, n_valid, equal_in_out, compute_dtype, roll_dir):
    def kernel(*refs):
        if equal_in_out:
            x_ref, w1_ref, w2_ref, a1_ref, s_ref, sums_ref = refs
            ws_ref = None
        else:
            x_ref, w1_ref, w2_ref, ws_ref, a1_ref, s_ref, sums_ref = refs

        t = pl.program_id(0)
        col = jax.lax.broadcasted_iota(jnp.int32, (1, tile_n), 1)
        col_mod = col % L                 # tile_n % L == 0 -> local == global
        masks = _make_shift_masks(col_mod, L, K)   # hoisted: reused by both convs

        x = x_ref[...]
        xs = _shifted_stack(x, masks, K, roll_dir)
        y1 = jnp.dot(w1_ref[...], xs, preferred_element_type=jnp.float32)
        # bn1 folded into per-channel (scale, shift), then ReLU
        h = jnp.maximum(y1 * a1_ref[:, 0:1] + a1_ref[:, 1:2], 0.0)
        # zero padded (fake) segments so conv2 / BN2 stats see exact zeros there
        h = jnp.where(t * tile_n + col < n_valid, h, 0.0)

        hs = _shifted_stack(h.astype(compute_dtype), masks, K, roll_dir)
        y2 = jnp.dot(w2_ref[...], hs, preferred_element_type=jnp.float32)
        if equal_in_out:
            sc = x.astype(jnp.float32)    # identity shortcut, no 1x1 matmul
        else:
            sc = jnp.dot(ws_ref[...], x, preferred_element_type=jnp.float32)
        s = sc + y2                        # conv2 bias dropped (cancelled by BN2)

        s_ref[...] = s
        sums_ref[0] = jnp.concatenate(
            [jnp.sum(s, axis=1, keepdims=True),
             jnp.sum(s * s, axis=1, keepdims=True)], axis=1)
    return kernel


def _bn_relu_kernel(s_ref, a2_ref, o_ref):
    o_ref[...] = jnp.maximum(s_ref[...] * a2_ref[:, 0:1] + a2_ref[:, 1:2], 0.0)


# -----------------------------------------------------------------------------
# Wrapper
# -----------------------------------------------------------------------------
def _fold_bn(sums, n, gamma, beta):
    """(C,2) [sum, sumsq] -> packed per-channel (scale, shift) of shape (C,2)."""
    mean = sums[:, 0] / n
    var = jnp.maximum(sums[:, 1] / n - mean * mean, 0.0)
    scale = gamma * jax.lax.rsqrt(var + _EPS)
    shift = beta - mean * scale
    return jnp.stack([scale, shift], axis=1).astype(jnp.float32)


def residual_block_forward(x, params, *, compute_dtype=jnp.float32,
                           target_lanes=512):
    """x: (B, C_in, L) float32 (PyTorch NCL).  Returns (B, C_out, L) float32."""
    B, C_in, L = x.shape
    w1, w2 = params["w1"], params["w2"]
    C_out, _, K = w1.shape
    equal_in_out = (C_in == C_out)
    roll_dir = _roll_direction()

    # lane-axis tiling: segment-aligned (multiple of L) and lane-dense (mult of 128)
    N = B * L
    seg = _lcm(L, 128)
    tile_n = max(seg, (target_lanes // seg) * seg)
    tile_n = min(tile_n, -(-N // seg) * seg)
    num_tiles = -(-N // tile_n)
    N_pad = num_tiles * tile_n

    # plain-JAX glue: layout conversion + fused-weight packing (taps folded in)
    x2 = jnp.transpose(x, (1, 0, 2)).reshape(C_in, N)
    x2 = jnp.pad(x2, ((0, 0), (0, N_pad - N))).astype(compute_dtype)
    w1st = jnp.transpose(w1, (0, 2, 1)).reshape(C_out, K * C_in).astype(compute_dtype)
    w2st = jnp.transpose(w2, (0, 2, 1)).reshape(C_out, K * C_out).astype(compute_dtype)

    def full_spec(shape):
        return pl.BlockSpec(shape, lambda t: (0,) * len(shape))

    x_spec = pl.BlockSpec((C_in, tile_n), lambda t: (0, t))
    s_spec = pl.BlockSpec((C_out, tile_n), lambda t: (0, t))
    sums_shape = jax.ShapeDtypeStruct((num_tiles, C_out, 2), jnp.float32)
    sums_spec = pl.BlockSpec((1, C_out, 2), lambda t: (t, 0, 0))

    # pass 1: per-tile (sum, sumsq) partials of conv1(x)  -> BN1 stats
    sums1 = pl.pallas_call(
        _make_stats1_kernel(L, K, tile_n, roll_dir),
        out_shape=sums_shape,
        grid=(num_tiles,),
        in_specs=[x_spec, full_spec((C_out, K * C_in))],
        out_specs=sums_spec,
        compiler_params=_cparams(),
    )(x2, w1st)
    a1 = _fold_bn(jnp.sum(sums1, axis=0), N, params["g1"], params["be1"])

    # pass 2: s = conv2(relu(bn1(conv1 x))) + shortcut(x)  (+ BN2 stat partials)
    args = [x2, w1st, w2st]
    in_specs = [x_spec, full_spec((C_out, K * C_in)), full_spec((C_out, K * C_out))]
    if not equal_in_out:
        args.append(params["ws"].astype(compute_dtype))
        in_specs.append(full_spec((C_out, C_in)))
    args.append(a1)
    in_specs.append(full_spec((C_out, 2)))

    s_pad, sums2 = pl.pallas_call(
        _make_main_kernel(L, K, tile_n, N, equal_in_out, compute_dtype, roll_dir),
        out_shape=(jax.ShapeDtypeStruct((C_out, N_pad), jnp.float32), sums_shape),
        grid=(num_tiles,),
        in_specs=in_specs,
        out_specs=(s_spec, sums_spec),
        compiler_params=_cparams(),
    )(*args)
    a2 = _fold_bn(jnp.sum(sums2, axis=0), N, params["g2"], params["be2"])

    # pass 3: out = relu(bn2(s))
    out_pad = pl.pallas_call(
        _bn_relu_kernel,
        out_shape=jax.ShapeDtypeStruct((C_out, N_pad), jnp.float32),
        grid=(num_tiles,),
        in_specs=[s_spec, full_spec((C_out, 2))],
        out_specs=s_spec,
        compiler_params=_cparams(),
    )(s_pad, a2)

    return jnp.transpose(out_pad[:, :N].reshape(C_out, B, L), (1, 0, 2))


# -----------------------------------------------------------------------------
# Pure-JAX reference (mirrors the PyTorch forward) for verification.
# -----------------------------------------------------------------------------
def _ref_forward(x, params):
    def conv(a, w, b=None):
        Bn, Ci, L = a.shape
        Kw = w.shape[-1]
        p = (Kw - 1) // 2
        ap = jnp.pad(a, ((0, 0), (0, 0), (p, p)))
        out = jnp.zeros((Bn, w.shape[0], L), jnp.float32)
        for k in range(Kw):
            out = out + jnp.einsum("bcl,oc->bol", ap[:, :, k:k + L], w[:, :, k])
        if b is not None:
            out = out + b[None, :, None]
        return out

    def bn(a, g, be):
        m = jnp.mean(a, axis=(0, 2), keepdims=True)
        v = jnp.mean((a - m) ** 2, axis=(0, 2), keepdims=True)
        return (a - m) / jnp.sqrt(v + _EPS) * g[None, :, None] + be[None, :, None]

    h = jax.nn.relu(bn(conv(x, params["w1"], params["b1"]),
                       params["g1"], params["be1"]))
    y2 = conv(h, params["w2"], params["b2"])
    sc = jnp.einsum("bcl,oc->bol", x, params["ws"]) if "ws" in params else x
    return jax.nn.relu(bn(sc + y2, params["g2"], params["be2"]))


if __name__ == "__main__":
    key = jax.random.PRNGKey(0)

    def make_params(k, C_in, C_out, K, with_shortcut):
        ks = jax.random.split(k, 9)
        p = {
            "w1": 0.2 * jax.random.normal(ks[0], (C_out, C_in, K), jnp.float32),
            "b1": 0.1 * jax.random.normal(ks[1], (C_out,), jnp.float32),
            "w2": 0.2 * jax.random.normal(ks[2], (C_out, C_out, K), jnp.float32),
            "b2": 0.1 * jax.random.normal(ks[3], (C_out,), jnp.float32),
            "g1": 1.0 + 0.1 * jax.random.normal(ks[4], (C_out,), jnp.float32),
            "be1": 0.1 * jax.random.normal(ks[5], (C_out,), jnp.float32),
            "g2": 1.0 + 0.1 * jax.random.normal(ks[6], (C_out,), jnp.float32),
            "be2": 0.1 * jax.random.normal(ks[7], (C_out,), jnp.float32),
        }
        if with_shortcut:
            p["ws"] = 0.2 * jax.random.normal(ks[8], (C_out, C_in), jnp.float32)
        return p

    # test 1: convShortcut path (C_in != C_out), multi-tile grid, f32
    B, C_in, C_out, L, K = 20, 4, 8, 16, 3
    params = make_params(key, C_in, C_out, K, with_shortcut=True)
    x = jax.random.normal(jax.random.fold_in(key, 1), (B, C_in, L), jnp.float32)
    out = residual_block_forward(x, params, target_lanes=128)  # force 3 lane tiles
    jax.block_until_ready(out)
    ref = _ref_forward(x, params)
    assert out.shape == (B, C_out, L), out.shape
    err = float(jnp.max(jnp.abs(out - ref)))
    assert err < 5e-4, f"shortcut-path mismatch vs reference: {err}"

    # test 2: equalInOut path (identity shortcut), single tile, f32
    params_eq = make_params(jax.random.fold_in(key, 2), C_out, C_out, K,
                            with_shortcut=False)
    x_eq = jax.random.normal(jax.random.fold_in(key, 3), (2, C_out, L), jnp.float32)
    out_eq = residual_block_forward(x_eq, params_eq)
    ref_eq = _ref_forward(x_eq, params_eq)
    err_eq = float(jnp.max(jnp.abs(out_eq - ref_eq)))
    assert err_eq < 5e-4, f"equalInOut-path mismatch vs reference: {err_eq}"

    # test 3: bf16 MXU operands (f32 accumulation & BN), loose tolerance
    out_bf16 = residual_block_forward(x, params, compute_dtype=jnp.bfloat16,
                                      target_lanes=128)
    err_bf16 = float(jnp.max(jnp.abs(out_bf16 - ref)))
    assert err_bf16 < 0.1, f"bf16 path mismatch vs f32 reference: {err_bf16}"

    print("KERNEL_OK")
</pallas_src>

<mosaic_0001>
module attributes {stable_mosaic.version = 11 : i64} {
  func.func @probe(%arg0: memref<8x256xf32, #tpu.memory_space<vmem>>, %arg1: memref<2x8x256xf32, #tpu.memory_space<vmem>>) attributes {dimension_semantics = [], scalar_prefetch = 0 : i64, scratch_operands = 0 : i64, tpu.core_type = #tpu.core_type<tc>} {
    %c0 = arith.constant 0 : index
    %c0_0 = arith.constant 0 : index
    %0 = vector.load %arg0[%c0, %c0_0] : memref<8x256xf32, #tpu.memory_space<vmem>>, vector<8x256xf32>
    %c1_i32 = arith.constant 1 : i32
    %1 = tpu.dynamic_rotate %0 by %c1_i32 dim 1 : vector<8x256xf32>, i32 -> vector<8x256xf32>
    %c0_1 = arith.constant 0 : index
    %c0_2 = arith.constant 0 : index
    %c0_3 = arith.constant 0 : index
    %2 = vector.load %arg1[%c0_1, %c0_2, %c0_3] : memref<2x8x256xf32, #tpu.memory_space<vmem>>, vector<1x8x256xf32>
    %3 = vector.shape_cast %2 : vector<1x8x256xf32> to vector<8x256xf32>
    %4 = vector.shape_cast %1 : vector<8x256xf32> to vector<1x8x256xf32>
    tpu.vector_store %arg1[%c0_1, %c0_2, %c0_3], %4 {strides = array<i32>} : memref<2x8x256xf32, #tpu.memory_space<vmem>>, vector<1x8x256xf32>,
    %c0_4 = arith.constant 0 : index
    %c0_5 = arith.constant 0 : index
    %5 = vector.load %arg0[%c0_4, %c0_5] : memref<8x256xf32, #tpu.memory_space<vmem>>, vector<8x256xf32>
    %c255_i32 = arith.constant 255 : i32
    %6 = tpu.dynamic_rotate %5 by %c255_i32 dim 1 : vector<8x256xf32>, i32 -> vector<8x256xf32>
    %c1 = arith.constant 1 : index
    %c0_6 = arith.constant 0 : index
    %c0_7 = arith.constant 0 : index
    %7 = vector.load %arg1[%c1, %c0_6, %c0_7] : memref<2x8x256xf32, #tpu.memory_space<vmem>>, vector<1x8x256xf32>
    %8 = vector.shape_cast %7 : vector<1x8x256xf32> to vector<8x256xf32>
    %9 = vector.shape_cast %6 : vector<8x256xf32> to vector<1x8x256xf32>
    tpu.vector_store %arg1[%c1, %c0_6, %c0_7], %9 {strides = array<i32>} : memref<2x8x256xf32, #tpu.memory_space<vmem>>, vector<1x8x256xf32>,
    return
  }
}

module attributes {stable_mosaic.version = 11 : i64} {
  func.func @kernel(%arg0: i32, %arg1: memref<4x128xf32, #tpu.memory_space<vmem>>, %arg2: memref<8x12xf32, #tpu.memory_space<vmem>>, %arg3: memref<1x8x2xf32, #tpu.memory_space<vmem>>) attributes {dimension_semantics = [#tpu.dimension_semantics<parallel>], iteration_bounds = array<i64: 3>, scalar_prefetch = 0 : i64, scratch_operands = 0 : i64, tpu.core_type = #tpu.core_type<tc>, window_params = [{transform_indices = @transform_0, window_bounds = array<i64: 4, 128>}, {pipeline_mode = #tpu.pipeline_mode<synchronous>, transform_indices = @transform_1, window_bounds = array<i64: 8, 12>}, {transform_indices = @transform_2, window_bounds = array<i64: 1, 8, 2>}]} {
    %0 = tpu.iota {dimensions = array<i32: 1>} : vector<1x128xi32>
    %c16_i32 = arith.constant 16 : i32
    %c0_i32 = arith.constant 0 : i32
    %1 = arith.cmpi eq, %c16_i32, %c0_i32 : i32
    %c1_i32 = arith.constant 1 : i32
    %2 = arith.select %1, %c1_i32, %c16_i32 : i32
    %3 = vector.broadcast %2 : i32 to vector<1x128xi32>
    %4 = arith.remsi %0, %3 : vector<1x128xi32>
    %c0_i32_0 = arith.constant 0 : i32
    %5 = vector.broadcast %c0_i32_0 : i32 to vector<1x128xi32>
    %6 = arith.cmpi ne, %4, %5 : vector<1x128xi32>
    %c0_i32_1 = arith.constant 0 : i32
    %7 = vector.broadcast %c0_i32_1 : i32 to vector<1x128xi32>
    %8 = arith.cmpi slt, %4, %7 : vector<1x128xi32>
    %c0_i32_2 = arith.constant 0 : i32
    %9 = arith.cmpi slt, %2, %c0_i32_2 : i32
    %10 = vector.broadcast %9 : i1 to vector<1x128xi1>
    %11 = vector.broadcast %10 : vector<1x128xi1> to vector<1x128xi1>
    %12 = arith.xori %8, %11 : vector<1x128xi1>
    %13 = arith.andi %12, %6 : vector<1x128xi1>
    %14 = vector.broadcast %2 : i32 to vector<1x128xi32>
    %15 = arith.addi %4, %14 : vector<1x128xi32>
    %16 = arith.select %13, %15, %4 : vector<1x128xi1>, vector<1x128xi32>
    %c1_i32_3 = arith.constant 1 : i32
    %17 = vector.broadcast %c1_i32_3 : i32 to vector<1x128xi32>
    %18 = arith.cmpi sge, %16, %17 : vector<1x128xi32>
    %c15_i32 = arith.constant 15 : i32
    %19 = vector.broadcast %c15_i32 : i32 to vector<1x128xi32>
    %20 = arith.cmpi slt, %16, %19 : vector<1x128xi32>
    %c0 = arith.constant 0 : index
    %c0_4 = arith.constant 0 : index
    %21 = vector.load %arg1[%c0, %c0_4] : memref<4x128xf32, #tpu.memory_space<vmem>>, vector<4x128xf32>
    %22 = vector.extract_strided_slice %21 {offsets = [0, 127], sizes = [4, 1], strides = [1, 1]} : vector<4x128xf32> to vector<4x1xf32>
    %23 = vector.extract_strided_slice %21 {offsets = [0, 0], sizes = [4, 127], strides = [1, 1]} : vector<4x128xf32> to vector<4x127xf32>
    %24 = tpu.concatenate %22, %23 in 1 : vector<4x1xf32>, vector<4x127xf32> -> vector<4x128xf32>
    %cst = arith.constant 0.000000e+00 : f32
    %25 = vector.shape_cast %18 : vector<1x128xi1> to vector<1x128xi1>
    %26 = vector.broadcast %25 : vector<1x128xi1> to vector<4x128xi1>
    %27 = vector.broadcast %cst : f32 to vector<4x128xf32>
    %28 = arith.select %26, %24, %27 : vector<4x128xi1>, vector<4x128xf32>
    %29 = vector.extract_strided_slice %21 {offsets = [0, 1], sizes = [4, 127], strides = [1, 1]} : vector<4x128xf32> to vector<4x127xf32>
    %30 = vector.extract_strided_slice %21 {offsets = [0, 0], sizes = [4, 1], strides = [1, 1]} : vector<4x128xf32> to vector<4x1xf32>
    %31 = tpu.concatenate %29, %30 in 1 : vector<4x127xf32>, vector<4x1xf32> -> vector<4x128xf32>
    %cst_5 = arith.constant 0.000000e+00 : f32
    %32 = vector.shape_cast %20 : vector<1x128xi1> to vector<1x128xi1>
    %33 = vector.broadcast %32 : vector<1x128xi1> to vector<4x128xi1>
    %34 = vector.broadcast %cst_5 : f32 to vector<4x128xf32>
    %35 = arith.select %33, %31, %34 : vector<4x128xi1>, vector<4x128xf32>
    %36 = tpu.concatenate %28, %21, %35 in 0 : vector<4x128xf32>, vector<4x128xf32>, vector<4x128xf32> -> vector<12x128xf32>
    %c0_6 = arith.constant 0 : index
    %c0_7 = arith.constant 0 : index
    %37 = vector.load %arg2[%c0_6, %c0_7] : memref<8x12xf32, #tpu.memory_space<vmem>>, vector<8x12xf32>
    %cst_8 = arith.constant dense<0.000000e+00> : vector<8x128xf32>
    %38 = tpu.matmul %37, %36, %cst_8 {dimension_numbers = #tpu.dot_dimension_numbers<[1], [0], [0], [1], [0, 0, 1, 1], [], []>} : vector<8x12xf32>, vector<12x128xf32>, vector<8x128xf32> -> vector<8x128xf32>
    %cst_9 = arith.constant dense<0.000000e+00> : vector<8xf32>
    %39 = vector.multi_reduction <add>, %38, %cst_9 [1] : vector<8x128xf32> to vector<8xf32>
    %40 = vector.shape_cast %39 : vector<8xf32> to vector<8x1xf32>
    %41 = arith.mulf %38, %38 : vector<8x128xf32>
    %cst_10 = arith.constant dense<0.000000e+00> : vector<8xf32>
    %42 = vector.multi_reduction <add>, %41, %cst_10 [1] : vector<8x128xf32> to vector<8xf32>
    %43 = vector.shape_cast %42 : vector<8xf32> to vector<8x1xf32>
    %44 = tpu.concatenate %40, %43 in 1 : vector<8x1xf32>, vector<8x1xf32> -> vector<8x2xf32>
    %c0_11 = arith.constant 0 : index
    %c0_12 = arith.constant 0 : index
    %c0_13 = arith.constant 0 : index
    %45 = vector.load %arg3[%c0_11, %c0_12, %c0_13] : memref<1x8x2xf32, #tpu.memory_space<vmem>>, vector<1x8x2xf32>
    %46 = vector.shape_cast %45 : vector<1x8x2xf32> to vector<8x2xf32>
    %47 = vector.shape_cast %44 : vector<8x2xf32> to vector<1x8x2xf32>
    tpu.vector_store %arg3[%c0_11, %c0_12, %c0_13], %47 {strides = array<i32>} : memref<1x8x2xf32, #tpu.memory_space<vmem>>, vector<1x8x2xf32>,
    return
  }
  func.func @transform_0(%arg0: i32) -> (i32, i32) {
    %c0_i32 = arith.constant 0 : i32
    %c0_i32_0 = arith.constant 0 : i32
    return %c0_i32, %arg0 : i32, i32
  }
  func.func @transform_1(%arg0: i32) -> (i32, i32) {
    %c0_i32 = arith.constant 0 : i32
    %c0_i32_0 = arith.constant 0 : i32
    %c0_i32_1 = arith.constant 0 : i32
    return %c0_i32, %c0_i32_0 : i32, i32
  }
  func.func @transform_2(%arg0: i32) -> (i32, i32, i32) {
    %c0_i32 = arith.constant 0 : i32
    %c0_i32_0 = arith.constant 0 : i32
    %c0_i32_1 = arith.constant 0 : i32
    return %arg0, %c0_i32, %c0_i32_0 : i32, i32, i32
  }
}

</mosaic_0001>

<bundles_post_ra>
// kernel: tpu_custom_call.1
= control target key start
LH: loop header
LB: loop body
LE: loop exit
PB: predicated region body
PF: predicated region fallthrough
CT: control target
= control target key end

     0   :  { %6 = vsyncpa [#allocation3], 0  ;;  %s157_s0 = inlined_call_operand.hbm [shape: f32[8,256], index: 0, kind: input, shape index: {}]   ;;  %s158_s1 = inlined_call_operand.hbm [shape: f32[2,8,256], index: 1, kind: output, shape index: {}]  }
   0x1   :  { %7 = vsyncpa [#allocation4], 0  ;;  %s117_s6 = smov [#allocation2]   ;;  %s69_s10 = scalar_lea.hbm %s157_s0, 256 }
   0x2   :  { %s14_s7 = sshll.u32 %s117_s6, 4  ;;  %p70_p0 = scmp.ne.s32.totalorder %s157_s0, %s69_s10  ;;  %s15_s7 = int_to_ptr.vmem [resolvable:$true] %s14_s7 }
   0x3   :  { %p73_p1 = scmp.lt.u32.totalorder %s69_s10, %s157_s0 }
   0x5   :  { %p75_p2 = pnand %p73_p1, %p70_p0 }
   0x7   :  { %78 = shalt.err (!%p75_p2)
}
   0x8   :  { %s79_s15 = scalar_lea.vmem %s15_s7, 256  ;;  %p84_p4 = scmp.lt.s32.totalorder %s15_s7, %s15_s7 }
   0x9   :  { %p80_p3 = scmp.ne.s32.totalorder %s15_s7, %s79_s15  ;;  %p85_p5 = scmp.lt.s32.totalorder %s79_s15, %s79_s15 }
   0xb   :  { %p86_p6 = por %p85_p5, %p84_p4 }
   0xd   :  { %p87_p7 = pnand %p86_p6, %p80_p3 }
   0xf   :  { %90 = shalt.err (!%p87_p7)
}
  0x10   :  { %17 = dma.hbm_to_vmem [thread:$0]  %s157_s0, 256, %s15_s7, [#allocation3]  }
  0x11   :  { %113 = dma.done.wait [#allocation3], 256  }
  0x12   :  { %114 = vsyncadd [#allocation3], 4294967040  ;;  %v34_v0 = vld [vmem:[#allocation2] sm:$0xff]  ;;  %s118_s18 = smov 127   ;;  %s119_s19 = smov 1   ;;  %v35_v1 = vld [vmem:[#allocation2 + $0x8] sm:$0xff]  ;;  %v27_v2 = vlaneseq }
  0x13   :  { %36 = vrot.lane.b32.xlu1 %v34_v0, %s118_s18  ;;  %23 = vrot.lane.b32.xlu0 %v34_v0, %s119_s19  ;;  %s120_s20 = smov [#allocation5]  }
  0x14   :  { %v28_v3 = vand.u32 127, %v27_v2  ;;  %s51_s21 = sshll.u32 %s120_s20, 4  ;;  %s52_s21 = int_to_ptr.vmem [resolvable:$true] %s51_s21 }
  0x15   :  { %s91_s0 = scalar_lea.vmem %s52_s21, 512  ;;  %p96_p9 = scmp.lt.s32.totalorder %s52_s21, %s52_s21 }
  0x16   :  { %vm40_vm0 = vcmp.lt.s32.totalorder %v28_v3, 127  ;;  %vm29_vm1 = vcmp.lt.s32.totalorder %v28_v3, 1  ;;  %p92_p8 = scmp.ne.s32.totalorder %s52_s21, %s91_s0  ;;  %p97_p10 = scmp.lt.s32.totalorder %s91_s0, %s91_s0 }
  0x17   :  { %38 = vrot.lane.b32.xlu1 %v35_v1, %s118_s18  ;;  %25 = vrot.lane.b32.xlu0 %v35_v1, %s119_s19 }
  0x18   :  { %p98_p11 = por %p97_p10, %p96_p9 }
  0x1a   :  { %p99_p12 = pnand %p98_p11, %p92_p8 }
  0x85   :  { %v37_v4 = vpop.permute.xlu1 %36  ;;  %v24_v5 = vpop.permute.xlu0 %23 }
  0x89   :  { %v39_v6 = vpop.permute.xlu1 %38  ;;  %v26_v7 = vpop.permute.xlu0 %25 }
  0x8a   :  { %v41_v8 = vsel %vm40_vm0, %v37_v4, %v39_v6  ;;  %v42_v9 = vsel %vm40_vm0, %v39_v6, %v37_v4  ;;  %v30_v10 = vsel %vm29_vm1, %v24_v5, %v26_v7  ;;  %v31_v11 = vsel %vm29_vm1, %v26_v7, %v24_v5 }
  0x8b   :  { %44 = vst [vmem:[#allocation5 + $0x10] sm:$0xff] %v41_v8  ;;  %45 = vst [vmem:[#allocation5 + $0x18] sm:$0xff] %v42_v9 }
  0x8c   :  { %32 = vst [vmem:[#allocation5] sm:$0xff] %v31_v11  ;;  %33 = vst [vmem:[#allocation5 + $0x8] sm:$0xff] %v30_v10 }
  0x8d   :  { %102 = shalt.err (!%p99_p12)
}
  0x8e   :  { %s103_s24 = scalar_lea.hbm %s158_s1, 512 }
  0x8f   :  { %p104_p13 = scmp.ne.s32.totalorder %s158_s1, %s103_s24  ;;  %p107_p0 = scmp.lt.u32.totalorder %s103_s24, %s158_s1 }
  0x91   :  { %p109_p1 = pnand %p107_p0, %p104_p13 }
  0x93   :  { %112 = shalt.err (!%p109_p1)
}
  0x94   :  { %s121_s29 = smov 256   ;;  %s122_s30 = smov 16  }
  0x95   :  { %57 = dma.vmem_to_hbm [thread:$0]  %s52_s21, 512, %s158_s1, [#allocation4], %s121_s29, %s121_s29, %s122_s30  }
  0x96   :  { %115 = dma.done.wait [#allocation4], 512  }
  0x97   :  { %116 = vsyncadd [#allocation4], 4294966784 }
  0x98   :  { %61 = vsyncpa [#allocation3], 1 }
  0x99   :  { %62 = vsyncpa [#allocation4], 1 }

// kernel: tpu_custom_call.1
= control target key start
LH: loop header
LB: loop body
LE: loop exit
PB: predicated region body
PF: predicated region fallthrough
CT: control target
= control target key end

     0   :  { %7 = vsyncpa [#allocation3], 0  ;;  %s721_s0 = inlined_call_operand.hbm [shape: f32[4,384], index: 0, kind: input, shape index: {}]   ;;  %s722_s1 = inlined_call_operand.hbm [shape: f32[8,12], index: 1, kind: input, shape index: {}]   ;;  %s723_s2 = inlined_call_operand.vmem [shape: f32[3,8,2], index: 2, kind: output, shape index: {}]  }
   0x1   :  { %9 = vsyncpa [#allocation3 + $0x1], 0 }
   0x2   :  { %10 = vsyncpa [#allocation5], 0  ;;  %s573_s9 = smov 0   ;;  %s575_s10 = smov 0  }
   0x3   :  { %s577_s11 = smov 0   ;;  %s579_s12 = smov 0  }
   0x4 LB: > { %s592_s13 = sadd.s32 4294967295, %s548_s12   ;;  %p36_p0 = scmp.ne.s32.totalorder %s540_s10, %s536_s9  ;;  %s548_s12 = sphi %s579_s12, %s741_s12   ;;  %s544_s11 = sphi %s577_s11, %s740_s11   ;;  %s540_s10 = sphi %s575_s10, %s739_s10   ;;  %s536_s9 = sphi %s573_s9, %s738_s9  }
   0x5   : > { %p724_p1 = scmp.eq.s32.totalorder %s592_s13, 0  ;;  %p369_p2 = scmp.ge.s32.totalorder %s548_s12, 1 }
   0x6   : > { %p94_p3 = scmp.lt.s32.totalorder %s548_s12, 4  ;;  %s550_s16 = smov [#allocation4]  }
   0x7   : > { %p600_p4 = por %p724_p1, %p36_p0  ;;  %s107_s17 = sshll.u32 %s550_s16, 4  ;;  %s108_s17 = int_to_ptr.vmem [resolvable:$true] %s107_s17 }
   0x8   : > { %p604_p5 = pnand %p369_p2, %p94_p3  ;;  %s611_s18 = sadd.s32 1, %s548_s12  }
   0x9   : > { %s727_s14 = scalar_select %p600_p4, 1, 0 }
   0xa   : > { %s728_s15 = scalar_select %p604_p5, 1, 0 }
   0xb   : > { %p402_p6 = pneg %p604_p5  ;;  %s20_s20 = ssub.s32 %s548_s12, %s611_s18 }
   0xc   : > { %p621_p8 = scmp.eq.s32.totalorder %s20_s20, 0  ;;  %s23_s22 = sadd.s32 1, %s544_s11 }
   0xd   : > { %p615_p7 = pnand %p402_p6, %p724_p1  ;;  %s452_s25 = scalar_lea.hbm %s722_s1, 128 }
   0xe   : > { %s730_s21 = scalar_select %p621_p8, 1, 0 }
   0xf   : > { %p453_p10 = scmp.ne.s32.totalorder %s722_s1, %s452_s25  ;;  %p454_p11 = pneg %p615_p7 }
  0x10   : > { %p459_p0 = scmp.lt.u32.totalorder %s452_s25, %s722_s1 }
  0x11   : > { %p455_p12 = pnand %p454_p11, %p453_p10 }
  0x13   : > { %p456_p13 = pneg %p455_p12 }
  0x15   : > { %p461_p2 = pnand %p459_p0, %p456_p13 }
  0x17   : > { %464 = shalt.err (!%p461_p2)
}
  0x18   : > { %s465_s30 = scalar_lea.vmem %s108_s17, 128  ;;  %p473_p9 = scmp.lt.s32.totalorder %s108_s17, %s108_s17 }
  0x19   : > { %p466_p3 = scmp.ne.s32.totalorder %s108_s17, %s465_s30  ;;  %p474_p4 = scmp.lt.s32.totalorder %s465_s30, %s465_s30 }
  0x1b   : > { %p468_p6 = pnand %p466_p3, %p454_p11  ;;  %p475_p5 = por %p474_p4, %p473_p9 }
  0x1d   : > { %p469_p1 = pneg %p468_p6 }
  0x1f   : > { %p476_p8 = pnand %p475_p5, %p469_p1 }
  0x21   : > { %479 = shalt.err (!%p476_p8)
}
  0x22   : > { %405 = dma.hbm_to_vmem [thread:$0]  (!%p615_p7), %s722_s1, 128, %s108_s17, [#allocation5]  }
  0x23   : > { %p731_p10 = scmp.ne.s32.totalorder %s730_s21, 0  ;;  %p31_p4 = scmp.eq.s32.totalorder %s548_s12, 0 }
  0x24   : > { %p411_p1 = scmp.lt.s32.totalorder %s548_s12, 3  ;;  %s118_s6 = sand.u32 1, %s544_s11  }
  0x25   : > { %s647_s5 = scalar_select %p731_p10, %s544_s11, %s23_s22  }
  0x26   : > { %s373_s7 = sshll.u32 %s548_s12, 6  ;;  %p732_p5 = scmp.ne.s32.totalorder %s544_s11, %s540_s10 }
  0x27   : > { %s372_s8 = sshll.u32 %s118_s6, 2  ;;  %s659_s19 = scalar_lea.hbm %s721_s0, %s373_s7 }
  0x28   : > { %p32_p8 = por %p31_p4, %p732_p5  ;;  %s122_s20 = scalar_lea.vmem [#allocation2], %s372_s8 }
  0x29   : > { %s129_s12 = sshll.u32 %s122_s20, 4  ;;  %s119_s21 = scalar_lea.sflag [#allocation3], %s118_s6  ;;  %s665_s12 = int_to_ptr.vmem [resolvable:$true] %s129_s12 }
  0x2a   : > { %p661_p7 = pnand %p411_p1, %p32_p8  ;;  %s480_s22 = scalar_lea.hbm %s659_s19, 64 }
  0x2b   : > { %p481_p9 = scmp.ne.s32.totalorder %s659_s19, %s480_s22  ;;  %s485_s25 = scalar_lea.hbm %s721_s0, 192 }
  0x2c   : > { %p482_p11 = pneg %p661_p7  ;;  %p486_p0 = scmp.lt.u32.totalorder %s659_s19, %s721_s0 }
  0x2d   : > { %p487_p2 = scmp.lt.u32.totalorder %s485_s25, %s480_s22  ;;  %p489_p6 = scmp.lt.u32.totalorder %s480_s22, %s659_s19 }
  0x2e   : > { %p483_p12 = pnand %p482_p11, %p481_p9 }
  0x2f   : > { %p488_p3 = por %p487_p2, %p486_p0 }
  0x30   : > { %p484_p13 = pneg %p483_p12 }
  0x31   : > { %p490_p10 = por %p489_p6, %p488_p3 }
  0x33   : > { %p491_p4 = pnand %p490_p10, %p484_p13 }
  0x35   : > { %494 = shalt.err (!%p491_p4)
}
  0x36   : > { %s495_s28 = scalar_lea.vmem %s665_s12, 64  ;;  %s551_s29 = smov [#allocation2]  }
  0x37   : > { %p496_p1 = scmp.ne.s32.totalorder %s665_s12, %s495_s28  ;;  %s500_s30 = sshll.u32 %s551_s29, 4  ;;  %s501_s30 = int_to_ptr.vmem [resolvable:$false] %s500_s30 }
  0x38   : > { %s502_s3 = scalar_lea.vmem %s501_s30, 128  ;;  %p503_p9 = scmp.lt.s32.totalorder %s665_s12, %s501_s30 }
  0x39   : > { %p498_p5 = pnand %p496_p1, %p482_p11  ;;  %p504_p12 = scmp.lt.s32.totalorder %s502_s3, %s495_s28 }
  0x3b   : > { %p499_p8 = pneg %p498_p5  ;;  %p505_p0 = por %p504_p12, %p503_p9 }
  0x3d   : > { %p506_p2 = pnand %p505_p0, %p499_p8 }
  0x3f   : > { %509 = shalt.err (!%p506_p2)
}
  0x40   : > { %409 = dma.hbm_to_vmem [thread:$0]  (!%p661_p7), %s659_s19, 64, %s665_s12, %s119_s21  }
  0x41   : > { %p734_p13 = scmp.ne.s32.totalorder %s728_s15, 0 }
  0x42   : > { %s140_s4 = sand.u32 (!%p734_p13), 1, %s540_s10   ;;  %p735_p11 = scmp.ne.s32.totalorder (!%p734_p13), %s727_s14, 0 }
  0x43   : > { %138 = sbr.rel (%p734_p13) target bundleno = 565 (0x235), region = 28  ;;  %s375_s6 = sshll.u32 (!%p734_p13), %s140_s4, 2 }
  0x44   : > { %s141_s7 = scalar_lea.sflag (!%p734_p13), [#allocation3], %s140_s4  ;;  %s144_s8 = scalar_lea.vmem (!%p734_p13), [#allocation2], %s375_s6 }
  0x4a   : > { %527 = dma.done.wait (%p735_p11), %s141_s7, 64  }
  0x4b   : > { %529 = vsyncadd (%p735_p11), %s141_s7, 4294967232  ;;  %p736_p3 = scmp.eq.s32.totalorder %s592_s13, 0 }
  0x4d   : > { %531 = dma.done.wait (%p736_p3), [#allocation5], 128   ;;  %p737_p6 = pmov %p736_p3 }
  0x4e   : > { %v552_v0 = vmov 0.0|0.0   ;;  %vm553_vm0 = vmmov 0   ;;  %v554_v1 = vmov 0.0   ;;  %v188_v2 = vld [vmem:[%s144_s8] sm:$0xf]  ;;  %s555_s15 = smov 1   ;;  %v172_v3 = vlaneseq }
  0x4f   : > { %533 = vsyncadd (%p737_p6), [#allocation5], 4294967168  ;;  %392 = vmatprep.subr.bf16.mxu0 %v552_v0  ;;  %389 = vmatprep.mubr.msk.f32.mxu0 %vm553_vm0, %v554_v1  ;;  %s556_s9 = smov 127   ;;  %v203_v7 = vrot.slane %v188_v2, 4  ;;  %vm205_vm3 = vcmask 1043456   ;;  %vm557_vm4 = vmmov 1  }
  0x50   : > { %190 = vrot.lane.b32.xlu0 %v188_v2, %s555_s15  ;;  %v173_v4 = vand.u32 127, %v172_v3  ;;  %vm394_vm5 = vmpackc.low %vm205_vm3, %vm557_vm4  ;;  %v207_v13 = vld [vmem:[#allocation4] sm:$0xff]  ;;  %vm208_vm6 = vcmask 97280   ;;  %p168_p7 = scmp.lt.s32.totalorder %s592_s13, 2  ;;  %vm193_vm7 = vcmask 7168   ;;  %vm291_vm8 = vcmask 15360  }
  0x52   : > { %v178_v5 = vand.u32 15, %v173_v4  ;;  %s743_s13 = smov (!%p168_p7, %s592_s13), 2 }
  0x53   : > { %s377_s14 = sshll.u32 %s743_s13, 3 }
  0x54   : > { %197 = vrot.lane.b32.xlu0 %v188_v2, %s556_s9  ;;  %vm186_vm1 = vcmp.ge.s32.totalorder %v178_v5, 1  ;;  %vm187_vm2 = vcmp.lt.s32.totalorder %v178_v5, 15  ;;  %s171_s17 = scalar_lea.vmem %s723_s2, %s377_s14 }
  0xc2   : > { %v191_v6 = vpop.permute.xlu0 %190 }
  0xc3   : > { %v196_v8 = vsel %vm186_vm1, %v191_v6, 0.0 }
  0xc4   : > { %v206_v11 = vsel %vm205_vm3, %v196_v8, %v203_v7 }
  0xc6   : > { %v198_v9 = vpop.permute.xlu0 %197 }
  0xc7   : > { %v202_v10 = vsel %vm187_vm2, %v198_v9, 0.0 }
  0xc8   : > { %v393_v12 = vpack.c.bf16 %v202_v10, %v206_v11 }
  0xca   : > { %395 = vmatpush3.bf16.msk.msra.mxu0 %vm394_vm5, %v393_v12 }
  0xcd   : > { %390 = vmatmul.mubr.msk.f32.vlgmr.msra.gmra.mrb[0].mxu0 %vm208_vm6, %v207_v13 }
 0x1a0   : > { %v281_v14 = vpop.f32.mrb[0].mxu0 }
 0x1a1   : > { %285 = vadd.xlane.f32.xlu1 %v281_v14  ;;  %v391_v15 = vpop.f32.mrb[1].mxu0  ;;  %v287_v16 = vmul.f32 %v281_v14, %v281_v14 }
 0x1a5   : > { %288 = vadd.xlane.f32.xlu1 %v287_v16 }
 0x22e   : > { %v286_v17 = vpop.xlane.xlu1 %285 }
 0x232   : > { %v289_v18 = vpop.xlane.xlu1 %288 }
 0x233   : > { %v290_v19 = vsel %vm193_vm7, %v286_v17, %v289_v18 }
 0x234   : > { %292 = vst.msk [vmem:[%s171_s17] sm:$0xff] %vm291_vm8, %v290_v19 }
 0x235 PF: > { %p13_p10 = scmp.ge.s32.totalorder %s611_s18, 5   ;;  %s738_s9 = smov %s540_s10 }
 0x236   : > { %s739_s10 = smov %s544_s11  ;;  %s740_s11 = smov %s647_s5 }
 0x237   : > { %s741_s12 = smov %s611_s18  ;;  %15 = sbr.rel (!%p13_p10) target bundleno = 4 (0x4), region = 72 }
 0x23e   :  { %312 = vsyncpa [#allocation3], 1 }
 0x23f   :  { %314 = vsyncpa [#allocation3 + $0x1], 1 }
 0x240   :  { %315 = vsyncpa [#allocation5], 1 }

</bundles_post_ra>
